<compile_context>
chip_gen: v6e
topology: v6e:2x2x1
jax: 0.10.0
libtpu: 0.0.40
codegen_flags: <defaults>
</compile_context>

<pallas_src>
import jax
import jax.numpy as jnp
from jax.experimental import pallas as pl
from jax.experimental.pallas import tpu as pltpu

IN_FEATURES = 10
OUT_FEATURES = 2
MAX_TM = 4096      # max batch rows per grid step (VMEM: ~2 MiB/buffer with lane padding)
MIN_SPLIT = 512    # above 2*MIN_SPLIT rows, force >=2 grid steps so both v7x TCs get work


def _round_up(n: int, m: int) -> int:
    return (n + m - 1) // m * m


def _cdiv(a: int, b: int) -> int:
    return (a + b - 1) // b


def _choose_tiling(batch: int):
    """Pick (tm, b_pad) so padding is minimal and large batches get >=2 grid steps."""
    b8 = _round_up(batch, 8)
    num_tiles = max(1, _cdiv(b8, MAX_TM))
    if num_tiles == 1 and b8 >= 2 * MIN_SPLIT:
        num_tiles = 2                      # let megacore / 2-TC chips shard the rows
    tm = _round_up(_cdiv(b8, num_tiles), 8)
    b_pad = num_tiles * tm
    return tm, b_pad


def linear_kernel(x_ref, w_ref, b_ref, o_ref):
    # x_ref: (tm, 10) streamed batch tile   (double-buffered DMA)
    # w_ref: (10, 2)  resident weight block (constant index_map, fetched once)
    # b_ref: (1, 2)   resident bias block
    # o_ref: (tm, 2)  narrow output block   (dense HBM writeback)
    acc = jnp.dot(
        x_ref[...],
        w_ref[...],
        preferred_element_type=jnp.float32,
        precision=jax.lax.Precision.HIGHEST,
    )
    o_ref[...] = (acc + b_ref[...].astype(jnp.float32)).astype(o_ref.dtype)


def simple_model_forward(x, weight, bias):
    """y = x @ weight.T + bias.  weight: (OUT, IN) PyTorch layout, bias: (OUT,)."""
    batch = x.shape[0]
    tm, b_pad = _choose_tiling(batch)
    if b_pad != batch:
        # Only hit when batch doesn't already fit the tiling (demo batch=8 skips this).
        x = jnp.pad(x, ((0, b_pad - batch), (0, 0)))

    w = weight.T.astype(x.dtype)                 # (IN_FEATURES, OUT_FEATURES)
    b = bias.reshape(1, OUT_FEATURES).astype(x.dtype)

    itemsize = jnp.dtype(x.dtype).itemsize
    cost = pl.CostEstimate(
        flops=2 * b_pad * IN_FEATURES * OUT_FEATURES,
        transcendentals=0,
        bytes_accessed=(b_pad * IN_FEATURES + IN_FEATURES * OUT_FEATURES
                        + OUT_FEATURES + b_pad * OUT_FEATURES) * itemsize,
    )

    out = pl.pallas_call(
        linear_kernel,
        out_shape=jax.ShapeDtypeStruct((b_pad, OUT_FEATURES), x.dtype),
        grid_spec=pltpu.PrefetchScalarGridSpec(
            num_scalar_prefetch=0,
            grid=(b_pad // tm,),
            in_specs=[
                pl.BlockSpec((tm, IN_FEATURES), lambda i: (i, 0)),            # batch tile
                pl.BlockSpec((IN_FEATURES, OUT_FEATURES), lambda i: (0, 0)),  # resident W
                pl.BlockSpec((1, OUT_FEATURES), lambda i: (0, 0)),            # resident bias
            ],
            out_specs=pl.BlockSpec((tm, OUT_FEATURES), lambda i: (i, 0)),
        ),
        compiler_params=pltpu.CompilerParams(
            dimension_semantics=("parallel",),
        ),
        cost_estimate=cost,
    )(x, w, b)

    return out[:batch]   # drop batch padding only; no column slice needed anymore


if __name__ == "__main__":
    key = jax.random.PRNGKey(0)
    kx, kw, kb = jax.random.split(key, 3)

    batch = 8
    x = jax.random.normal(kx, (batch, IN_FEATURES), dtype=jnp.float32)

    # nn.Linear-style init: U(-1/sqrt(in), 1/sqrt(in)); weight kept in PyTorch (out, in) layout.
    bound = 1.0 / (IN_FEATURES ** 0.5)
    weight = jax.random.uniform(kw, (OUT_FEATURES, IN_FEATURES),
                                minval=-bound, maxval=bound, dtype=jnp.float32)
    bias = jax.random.uniform(kb, (OUT_FEATURES,),
                              minval=-bound, maxval=bound, dtype=jnp.float32)

    y = simple_model_forward(x, weight, bias)
    y = jax.block_until_ready(y)

    y_ref = jnp.dot(x, weight.T, precision=jax.lax.Precision.HIGHEST) + bias
    assert y.shape == (batch, OUT_FEATURES)
    assert jnp.allclose(y, y_ref, atol=1e-5, rtol=1e-5)

    print("KERNEL_OK")
</pallas_src>

<mosaic_0001>
module attributes {stable_mosaic.version = 11 : i64} {
  func.func @linear_kernel(%arg0: i32, %arg1: memref<8x10xf32, #tpu.memory_space<vmem>>, %arg2: memref<10x2xf32, #tpu.memory_space<vmem>>, %arg3: memref<1x2xf32, #tpu.memory_space<vmem>>, %arg4: memref<8x2xf32, #tpu.memory_space<vmem>>) attributes {dimension_semantics = [#tpu.dimension_semantics<parallel>], iteration_bounds = array<i64: 1>, scalar_prefetch = 0 : i64, scratch_operands = 0 : i64, tpu.core_type = #tpu.core_type<tc>, window_params = [{transform_indices = @transform_0, window_bounds = array<i64: 8, 10>}, {pipeline_mode = #tpu.pipeline_mode<synchronous>, transform_indices = @transform_1, window_bounds = array<i64: 10, 2>}, {pipeline_mode = #tpu.pipeline_mode<synchronous>, transform_indices = @transform_2, window_bounds = array<i64: 1, 2>}, {transform_indices = @transform_3, window_bounds = array<i64: 8, 2>}]} {
    %c0 = arith.constant 0 : index
    %c0_0 = arith.constant 0 : index
    %0 = vector.load %arg1[%c0, %c0_0] : memref<8x10xf32, #tpu.memory_space<vmem>>, vector<8x10xf32>
    %c0_1 = arith.constant 0 : index
    %c0_2 = arith.constant 0 : index
    %1 = vector.load %arg2[%c0_1, %c0_2] : memref<10x2xf32, #tpu.memory_space<vmem>>, vector<10x2xf32>
    %cst = arith.constant dense<0.000000e+00> : vector<8x2xf32>
    %2 = tpu.matmul %0, %1, %cst {dimension_numbers = #tpu.dot_dimension_numbers<[1], [0], [0], [1], [0, 0, 1, 1], [], []>, precision = #tpu.contract_precision<fp32>} : vector<8x10xf32>, vector<10x2xf32>, vector<8x2xf32> -> vector<8x2xf32>
    %c0_3 = arith.constant 0 : index
    %c0_4 = arith.constant 0 : index
    %3 = vector.load %arg3[%c0_3, %c0_4] : memref<1x2xf32, #tpu.memory_space<vmem>>, vector<1x2xf32>
    %4 = vector.broadcast %3 : vector<1x2xf32> to vector<8x2xf32>
    %5 = arith.addf %2, %4 : vector<8x2xf32>
    %c0_5 = arith.constant 0 : index
    %c0_6 = arith.constant 0 : index
    %6 = vector.load %arg4[%c0_5, %c0_6] : memref<8x2xf32, #tpu.memory_space<vmem>>, vector<8x2xf32>
    tpu.vector_store %arg4[%c0_5, %c0_6], %5 {strides = array<i32>} : memref<8x2xf32, #tpu.memory_space<vmem>>, vector<8x2xf32>,
    return
  }
  func.func @transform_0(%arg0: i32) -> (i32, i32) {
    %c0_i32 = arith.constant 0 : i32
    %c0_i32_0 = arith.constant 0 : i32
    return %arg0, %c0_i32 : i32, i32
  }
  func.func @transform_1(%arg0: i32) -> (i32, i32) {
    %c0_i32 = arith.constant 0 : i32
    %c0_i32_0 = arith.constant 0 : i32
    %c0_i32_1 = arith.constant 0 : i32
    return %c0_i32, %c0_i32_0 : i32, i32
  }
  func.func @transform_2(%arg0: i32) -> (i32, i32) {
    %c0_i32 = arith.constant 0 : i32
    %c0_i32_0 = arith.constant 0 : i32
    %c0_i32_1 = arith.constant 0 : i32
    return %c0_i32, %c0_i32_0 : i32, i32
  }
  func.func @transform_3(%arg0: i32) -> (i32, i32) {
    %c0_i32 = arith.constant 0 : i32
    %c0_i32_0 = arith.constant 0 : i32
    return %arg0, %c0_i32 : i32, i32
  }
}

</mosaic_0001>

<bundles_post_ra>
// kernel: tpu_custom_call.1
= control target key start
LH: loop header
LB: loop body
LE: loop exit
PB: predicated region body
PF: predicated region fallthrough
CT: control target
= control target key end

     0   :  { %vm28_vm0 = vcmask 1041408   ;;  %vm24_vm1 = vcmask 80896   ;;  %v560_v0 = vmov 0.0   ;;  %vm561_vm2 = vmmov 0   ;;  %s603_s1 = inlined_call_operand.vmem [shape: f32[10,2], index: 1, kind: input, shape index: {}]   ;;  %s604_s0 = inlined_call_operand.vmem [shape: f32[8,10], index: 0, kind: input, shape index: {}]   ;;  %s605_s2 = inlined_call_operand.vmem [shape: f32[1,2], index: 2, kind: input, shape index: {}]   ;;  %s606_s3 = inlined_call_operand.vmem [shape: f32[8,2], index: 3, kind: output, shape index: {}]  }
   0x1   :  { %516 = vmatprep.subr.mxu0 %v560_v0  ;;  %v16_v1 = vld [vmem:[%s603_s1 + $0x8] sm:$0x3]  ;;  %v15_v2 = vld [vmem:[%s603_s1] sm:$0xff]  ;;  %520 = vmatprep.mubr.msk.f32.mxu0 %vm561_vm2, %v560_v0  ;;  %vm491_vm3 = vcmask 15360  }
   0x2   :  { %v14_v3 = vld [vmem:[%s604_s0] sm:$0xff]  ;;  %v30_v4 = vsel %vm28_vm0, %v16_v1, 0  ;;  %v64_v5 = vand.u32 4294901760, %v15_v2  ;;  %523 = vmatprep.subr.mxu1 %v560_v0  ;;  %527 = vmatprep.mubr.msk.f32.mxu1 %vm561_vm2, %v560_v0 }
   0x3   :  { %v26_v6 = vsel %vm24_vm1, %v14_v3, 0  ;;  %v61_v7 = vand.u32 4294901760, %v30_v4  ;;  %v497_v21 = vld [vmem:[%s605_s2] ss:$0 sm:$0xff] }
   0x4   :  { %v99_v8 = vand.u32 4294901760, %v26_v6  ;;  %v146_v9 = vsub.f32 %v15_v2, %v64_v5 }
   0x5   :  { %517 = vmatpush3.msra.mxu0 %v61_v7  ;;  %v139_v11 = vsub.f32 %v30_v4, %v61_v7 }
   0x6   :  { %v100_v10 = vsub.f32 %v26_v6, %v99_v8  ;;  %518 = vmatprep.subr.mxu0 %v560_v0  ;;  %v147_v12 = vand.u32 4294901760, %v146_v9 }
   0x7   :  { %519 = vmatpush3.msra.mxu0 %v64_v5  ;;  %v140_v14 = vand.u32 4294901760, %v139_v11 }
   0x8   :  { %v101_v13 = vand.u32 4294901760, %v100_v10  ;;  %530 = vmatprep.subr.mxu0 %v560_v0  ;;  %v148_v15 = vsub.f32 %v146_v9, %v147_v12 }
   0x9   :  { %v141_v17 = vsub.f32 %v139_v11, %v140_v14 }
   0xa   :  { %v102_v16 = vsub.f32 %v100_v10, %v101_v13  ;;  %v149_v20 = vand.u32 4294901760, %v148_v15 }
   0xb   :  { %v142_v19 = vand.u32 4294901760, %v141_v17 }
   0xc   :  { %v103_v18 = vand.u32 4294901760, %v102_v16 }
   0xd   :  { %524 = vmatpush3.msra.mxu1 %v142_v19 }
   0xe   :  { %521 = vmatmul.mubr.f32.vlgmr.msra.gmra.mxu0 %v103_v18  ;;  %525 = vmatprep.subr.mxu1 %v560_v0 }
   0xf   :  { %531 = vmatpush3.msra.mxu0 %v139_v11  ;;  %526 = vmatpush3.msra.mxu1 %v149_v20 }
  0x10   :  { %532 = vmatprep.subr.mxu0 %v560_v0  ;;  %528 = vmatmul.mubr.f32.vlgmr.msra.gmra.mxu1 %v99_v8 }
  0x11   :  { %533 = vmatpush3.msra.mxu0 %v146_v9  ;;  %534 = vmatprep.mubr.msk.f32.mxu0 %vm561_vm2, %v560_v0 }
  0x12   :  { %537 = vmatprep.subr.mxu1 %v560_v0  ;;  %535 = vmatmul.mubr.f32.vlgmr.msra.gmra.mxu0 %v100_v10 }
  0x13   :  { %538 = vmatpush3.msra.mxu1 %v61_v7  ;;  %544 = vmatprep.subr.mxu0 %v560_v0 }
  0x14   :  { %539 = vmatprep.subr.mxu1 %v560_v0  ;;  %545 = vmatpush3.msra.mxu0 %v140_v14 }
  0x15   :  { %540 = vmatpush3.msra.mxu1 %v64_v5  ;;  %541 = vmatprep.mubr.msk.f32.mxu1 %vm561_vm2, %v560_v0 }
  0x16   :  { %546 = vmatprep.subr.mxu0 %v560_v0  ;;  %542 = vmatmul.mubr.f32.vlgmr.msra.gmra.mxu1 %v101_v13 }
  0x17   :  { %547 = vmatpush3.msra.mxu0 %v147_v12  ;;  %548 = vmatprep.mubr.msk.f32.mxu0 %vm561_vm2, %v560_v0 }
  0x18   :  { %551 = vmatprep.subr.mxu1 %v560_v0  ;;  %549 = vmatmul.mubr.f32.vlgmr.msra.gmra.mxu0 %v99_v8 }
  0x19   :  { %552 = vmatpush3.msra.mxu1 %v61_v7  ;;  %555 = vmatprep.mubr.msk.f32.mxu1 %vm561_vm2, %v560_v0 }
  0x1a   :  { %553 = vmatprep.subr.mxu1 %v560_v0 }
  0x1b   :  { %554 = vmatpush3.msra.mxu1 %v64_v5 }
  0x1c   :  { %556 = vmatmul.mubr.f32.vlgmr.msra.gmra.mxu1 %v99_v8 }
  0xce   :  { %v105_v22 = vpop.f32.mrf.mxu0 }
  0xcf   :  { %v106_v23 = vadd.f32 %v497_v21, %v105_v22 }
  0xd0   :  { %v522_v24 = vpop.f32.mrf.mxu0  ;;  %v186_v25 = vpop.f32.mrf.mxu1 }
  0xd1   :  { %v187_v26 = vadd.f32 %v186_v25, %v106_v23 }
  0xd2   :  { %v262_v27 = vpop.f32.mrf.mxu0  ;;  %v529_v28 = vpop.f32.mrf.mxu1 }
  0xd3   :  { %v263_v29 = vadd.f32 %v262_v27, %v187_v26 }
  0xd4   :  { %v536_v30 = vpop.f32.mrf.mxu0 }
  0xd6   :  { %v337_v31 = vpop.f32.mrf.mxu1 }
  0xd7   :  { %v338_v32 = vadd.f32 %v337_v31, %v263_v29 }
  0xd8   :  { %v414_v33 = vpop.f32.mrf.mxu0  ;;  %v543_v34 = vpop.f32.mrf.mxu1 }
  0xd9   :  { %v415_v35 = vadd.f32 %v414_v33, %v338_v32 }
  0xda   :  { %v550_v36 = vpop.f32.mrf.mxu0 }
  0xdc   :  { %v487_v37 = vpop.f32.mrf.mxu1 }
  0xdd   :  { %v488_v38 = vadd.f32 %v487_v37, %v415_v35 }
  0xde   :  { %v557_v39 = vpop.f32.mrf.mxu1 }
  0xdf   :  { %492 = vst.msk [vmem:[%s606_s3] sm:$0xff] %vm491_vm3, %v488_v38 }

</bundles_post_ra>
